<compile_context>
chip_gen: v7x
topology: tpu7x:2x2x1
jax: 0.10.0
libtpu: 0.0.40
codegen_flags: <defaults>
</compile_context>

<pallas_src>
import functools

import jax
import jax.numpy as jnp
from jax.experimental import pallas as pl
from jax.experimental.pallas import tpu as pltpu


# ----------------------------------------------------------------------------
# Kernels
# ----------------------------------------------------------------------------

def _attn_single_kernel(qm_ref, xk_ref, vaug_ref, xres_ref, o_ref, *,
                        exp_in_bf16):
    # qm_ref  : (1, C, TQ)   bf16   (Wk_s^T Wq_s) @ x, query-position tile
    # xk_ref  : (1, C, N)    bf16   x over all key positions (channels-major)
    # vaug_ref: (1, C+1, N)  bf16   [gamma * Wv_s @ x ; ones] over all keys
    # xres_ref: (1, C, TQ)   f32    residual tile of x
    # o_ref   : (1, C, TQ)   f32
    C = o_ref.shape[1]
    qm = qm_ref[0]                                                   # (C, TQ)
    xk = xk_ref[0]                                                   # (C, N)

    # Transposed scores s_t[j, i] = <k_j, q_i>, contracting over all C
    # channels; keys live on sublanes so softmax stats stay lane-major (1,TQ).
    s_t = jax.lax.dot_general(xk, qm, (((0,), (0,)), ((), ())),
                              preferred_element_type=jnp.float32)    # (N, TQ)
    m = jnp.max(s_t, axis=0, keepdims=True)                          # (1, TQ)
    if exp_in_bf16:
        p_t = jnp.exp((s_t - m).astype(jnp.bfloat16))                # (N, TQ)
    else:
        p_t = jnp.exp(s_t - m).astype(jnp.bfloat16)

    # PV matmul.  Row C (the ones row of V_aug) is the softmax denominator;
    # rows :C already carry the gamma scale.
    acc = jnp.dot(vaug_ref[0], p_t,
                  preferred_element_type=jnp.float32)                # (C+1, TQ)
    inv_l = pl.reciprocal(acc[C:C + 1, :], approx=False)             # (1, TQ)
    o_ref[0] = acc[:C, :] * inv_l + xres_ref[0]


def _attn_flash_kernel(qm_ref, xk_ref, vaug_ref, xres_ref, o_ref,
                       m_sc, acc_sc, *, exp_in_bf16):
    # Flash-style fallback for very large N: grid = (B, N/TQ, N/TK), key axis
    # last ("arbitrary").  acc_sc row C carries the running softmax
    # denominator (ones row of V_aug), so one alpha rescale updates the value
    # accumulator and the denominator together (no separate l scratch / sum).
    C = o_ref.shape[1]
    ki = pl.program_id(2)

    @pl.when(ki == 0)
    def _init():
        m_sc[...] = jnp.full(m_sc.shape, -jnp.inf, m_sc.dtype)
        acc_sc[...] = jnp.zeros(acc_sc.shape, acc_sc.dtype)

    qm = qm_ref[0]                                                   # (C, TQ)
    xk = xk_ref[0]                                                   # (C, TK)
    s_t = jax.lax.dot_general(xk, qm, (((0,), (0,)), ((), ())),
                              preferred_element_type=jnp.float32)    # (TK, TQ)

    m_prev = m_sc[...]
    m_new = jnp.maximum(m_prev, jnp.max(s_t, axis=0, keepdims=True)) # (1, TQ)
    alpha = jnp.exp(m_prev - m_new)                                  # (1, TQ)
    if exp_in_bf16:
        p_t = jnp.exp((s_t - m_new).astype(jnp.bfloat16))
    else:
        p_t = jnp.exp(s_t - m_new).astype(jnp.bfloat16)
    m_sc[...] = m_new
    acc_sc[...] = alpha * acc_sc[...] + jnp.dot(
        vaug_ref[0], p_t, preferred_element_type=jnp.float32)        # (C+1, TQ)

    @pl.when(ki == pl.num_programs(2) - 1)
    def _finalize():
        acc = acc_sc[...]
        inv_l = pl.reciprocal(acc[C:C + 1, :], approx=False)
        o_ref[0] = acc[:C, :] * inv_l + xres_ref[0]


# ----------------------------------------------------------------------------
# Wrapper
# ----------------------------------------------------------------------------

def _pick_tile(n, cap):
    """Largest multiple of 128 that divides n and is <= cap (needs n%128==0)."""
    best, t = 128, 128
    while t <= min(n, cap):
        if n % t == 0:
            best = t
        t += 128
    return best


def _single_path_vmem_bytes(C, N, TQ):
    # Double-buffered input/output tiles + in-body intermediates (s_t, p_t, acc).
    in_b = C * TQ * 2 + C * N * 2 + (C + 1) * N * 2 + C * TQ * 4
    out_b = C * TQ * 4
    inter = N * TQ * 4 + N * TQ * 2 + (C + 1) * TQ * 4
    return 2 * (in_b + out_b) + inter


def _tpu_generation():
    try:
        return jax.devices()[0].device_kind.lower()
    except Exception:
        return ""


def self_attention(x_nchw, wq, wk, wv, gamma, bn_eps=1e-5,
                   tq_cap=512, tk_cap=512, force_flash=False):
    """x_nchw: (B, C, H, W); wq/wk: (C//8, C); wv: (C, C); gamma: scalar."""
    B, C, H, W = x_nchw.shape
    N = H * W
    assert C % 8 == 0, "in_channels must be divisible by 8"

    kind = _tpu_generation()
    # v7x: 64 MiB VMEM per TensorCore (vs 128 MiB on v5e/v6e); unknown -> safe.
    if "v7" in kind:
        vmem_limit = 48 * 1024 * 1024
    elif kind:
        vmem_limit = 96 * 1024 * 1024
    else:
        vmem_limit = 48 * 1024 * 1024
    # v5e has no bf16 VPU/EUP path: keep the exp in f32 there.
    exp_in_bf16 = "v5" not in kind

    # Fold eval-mode BatchNorm (mean=0, var=1, w=1, b=0) into the conv
    # weights, fold Wq/Wk into a single (C, C) matrix, precompute QM and V in
    # the wrapper and fold gamma into V (the ones row -- the softmax
    # denominator accumulator -- stays unscaled).
    scale = (1.0 + bn_eps) ** -0.5
    wq_s = wq.astype(jnp.float32) * scale                        # (C8, C)
    wk_s = wk.astype(jnp.float32) * scale                        # (C8, C)
    wv_s = wv.astype(jnp.float32) * scale                        # (C, C)
    a_kq = jnp.dot(wk_s.T, wq_s)                                 # (C, C)

    xf = x_nchw.astype(jnp.float32).reshape(B, C, N)             # channels-major
    qm = jnp.einsum('cd,bdn->bcn', a_kq, xf).astype(jnp.bfloat16)   # (B, C, N)
    val = jnp.einsum('cd,bdn->bcn', wv_s, xf)                        # (B, C, N)
    gamma_f = jnp.asarray(gamma, jnp.float32)
    v_aug = jnp.concatenate(
        [gamma_f * val, jnp.ones((B, 1, N), jnp.float32)],
        axis=1).astype(jnp.bfloat16)                                 # (B, C+1, N)
    x_bf = xf.astype(jnp.bfloat16)                                   # keys
    x_res = xf                                                       # f32 residual

    # Tile selection: single key tile whenever the footprint fits; TK/TQ are
    # multiples of 128 (512 default keeps TK a multiple of 256 for v6e's MXU).
    # Note (v7x megacore): keep B * (N // TQ) >= 2 so both TCs stay busy.
    use_flash = False
    if N % 128 == 0:
        TQ = _pick_tile(N, tq_cap)
        TK = N
        if force_flash or _single_path_vmem_bytes(C, N, TQ) > vmem_limit // 2:
            use_flash = True
            TK = _pick_tile(N, tk_cap)
    else:
        # Non-128-aligned spatial extent: blocks must span the full axis.
        TQ = N
        TK = N

    out_shape = jax.ShapeDtypeStruct((B, C, N), jnp.float32)

    if not use_flash:
        grid = (B, N // TQ)
        out = pl.pallas_call(
            functools.partial(_attn_single_kernel, exp_in_bf16=exp_in_bf16),
            out_shape=out_shape,
            grid_spec=pltpu.PrefetchScalarGridSpec(
                num_scalar_prefetch=0,
                grid=grid,
                in_specs=[
                    pl.BlockSpec((1, C, TQ), lambda b, qi: (b, 0, qi)),     # QM
                    pl.BlockSpec((1, C, N), lambda b, qi: (b, 0, 0)),       # keys
                    pl.BlockSpec((1, C + 1, N), lambda b, qi: (b, 0, 0)),   # V_aug
                    pl.BlockSpec((1, C, TQ), lambda b, qi: (b, 0, qi)),     # resid
                ],
                out_specs=pl.BlockSpec((1, C, TQ), lambda b, qi: (b, 0, qi)),
            ),
            compiler_params=pltpu.CompilerParams(
                dimension_semantics=("parallel", "parallel"),
                vmem_limit_bytes=vmem_limit),
        )(qm, x_bf, v_aug, x_res)
    else:
        grid = (B, N // TQ, N // TK)
        out = pl.pallas_call(
            functools.partial(_attn_flash_kernel, exp_in_bf16=exp_in_bf16),
            out_shape=out_shape,
            grid_spec=pltpu.PrefetchScalarGridSpec(
                num_scalar_prefetch=0,
                grid=grid,
                in_specs=[
                    pl.BlockSpec((1, C, TQ), lambda b, qi, ki: (b, 0, qi)),
                    pl.BlockSpec((1, C, TK), lambda b, qi, ki: (b, 0, ki)),
                    pl.BlockSpec((1, C + 1, TK), lambda b, qi, ki: (b, 0, ki)),
                    pl.BlockSpec((1, C, TQ), lambda b, qi, ki: (b, 0, qi)),
                ],
                out_specs=pl.BlockSpec((1, C, TQ), lambda b, qi, ki: (b, 0, qi)),
                scratch_shapes=[
                    pltpu.VMEM((1, TQ), jnp.float32),       # running max
                    pltpu.VMEM((C + 1, TQ), jnp.float32),   # acc (+ denom row)
                ],
            ),
            compiler_params=pltpu.CompilerParams(
                dimension_semantics=("parallel", "parallel", "arbitrary"),
                vmem_limit_bytes=vmem_limit),
        )(qm, x_bf, v_aug, x_res)

    # (B, C, N) -> NCHW is a pure reshape.
    return out.reshape(B, C, H, W)


# ----------------------------------------------------------------------------
# Pure-JAX reference and test
# ----------------------------------------------------------------------------

def reference(x_nchw, wq, wk, wv, gamma, bn_eps=1e-5):
    """Pure-JAX f32 reference mirroring the PyTorch forward (eval-mode BN)."""
    B, C, H, W = x_nchw.shape
    N = H * W
    scale = (1.0 + bn_eps) ** -0.5
    xf = x_nchw.reshape(B, C, N)
    q = jnp.einsum('oc,bcn->bon', wq * scale, xf)       # (B, C//8, N)
    k = jnp.einsum('oc,bcn->bon', wk * scale, xf)       # (B, C//8, N)
    v = jnp.einsum('oc,bcn->bon', wv * scale, xf)       # (B, C, N)
    attn_map = jnp.einsum('bon,bom->bnm', q, k)         # (B, Nq, Nk)
    attn = jax.nn.softmax(attn_map, axis=-1)            # softmax over keys
    out = jnp.einsum('bcm,bnm->bcn', v, attn)           # (B, C, Nq)
    return gamma * out.reshape(B, C, H, W) + x_nchw


if __name__ == "__main__":
    key = jax.random.PRNGKey(0)
    B, C, H, W = 2, 32, 16, 16          # in_channels must be divisible by 8
    C8 = C // 8

    kx, kq, kk, kv = jax.random.split(key, 4)
    x = jax.random.normal(kx, (B, C, H, W), dtype=jnp.float32)

    # kaiming_normal_ for 1x1 convs: std = sqrt(2 / fan_in), fan_in = C.
    std = (2.0 / C) ** 0.5
    wq = jax.random.normal(kq, (C8, C), dtype=jnp.float32) * std
    wk = jax.random.normal(kk, (C8, C), dtype=jnp.float32) * std
    wv = jax.random.normal(kv, (C, C), dtype=jnp.float32) * std

    # The module initializes gamma to 0 (output == x); use a nonzero value so
    # the attention path is actually exercised.
    gamma = jnp.float32(0.5)
    ref = reference(x, wq, wk, wv, gamma)

    # 1) Default path: single key tile (N = 256 fits easily in VMEM).
    out = jax.block_until_ready(self_attention(x, wq, wk, wv, gamma))
    assert out.shape == (B, C, H, W)
    max_err = float(jnp.max(jnp.abs(out - ref)))
    mean_err = float(jnp.mean(jnp.abs(out - ref)))
    # bf16 MXU operands (folded scores, probs, values) vs an all-f32 reference.
    assert jnp.allclose(out, ref, atol=1e-1, rtol=1e-1), (max_err, mean_err)
    assert mean_err < 1e-2, (max_err, mean_err)

    # 2) gamma = 0 (module init): output must reproduce x via the f32 residual.
    out0 = jax.block_until_ready(
        self_attention(x, wq, wk, wv, jnp.float32(0.0)))
    assert jnp.allclose(out0, x, atol=1e-6, rtol=0.0)

    # 3) Flash fallback (forced small tiles) used for very large N shapes.
    outf = jax.block_until_ready(
        self_attention(x, wq, wk, wv, gamma,
                       tq_cap=128, tk_cap=128, force_flash=True))
    max_err_f = float(jnp.max(jnp.abs(outf - ref)))
    mean_err_f = float(jnp.mean(jnp.abs(outf - ref)))
    assert jnp.allclose(outf, ref, atol=1e-1, rtol=1e-1), (max_err_f, mean_err_f)
    assert mean_err_f < 1e-2, (max_err_f, mean_err_f)

    print("KERNEL_OK")
</pallas_src>

<mosaic_0001>
module attributes {stable_mosaic.version = 11 : i64} {
  func.func @_attn_single_kernel(%arg0: i32, %arg1: i32, %arg2: memref<1x32x256xbf16, #tpu.memory_space<vmem>>, %arg3: memref<1x32x256xbf16, #tpu.memory_space<vmem>>, %arg4: memref<1x33x256xbf16, #tpu.memory_space<vmem>>, %arg5: memref<1x32x256xf32, #tpu.memory_space<vmem>>, %arg6: memref<1x32x256xf32, #tpu.memory_space<vmem>>) attributes {dimension_semantics = [#tpu.dimension_semantics<parallel>, #tpu.dimension_semantics<parallel>], iteration_bounds = array<i64: 2, 1>, scalar_prefetch = 0 : i64, scratch_operands = 0 : i64, tpu.core_type = #tpu.core_type<tc>, window_params = [{transform_indices = @transform_0, window_bounds = array<i64: 1, 32, 256>}, {transform_indices = @transform_1, window_bounds = array<i64: 1, 32, 256>}, {transform_indices = @transform_2, window_bounds = array<i64: 1, 33, 256>}, {transform_indices = @transform_3, window_bounds = array<i64: 1, 32, 256>}, {transform_indices = @transform_4, window_bounds = array<i64: 1, 32, 256>}]} {
    %c0 = arith.constant 0 : index
    %c0_0 = arith.constant 0 : index
    %c0_1 = arith.constant 0 : index
    %0 = vector.load %arg2[%c0, %c0_0, %c0_1] : memref<1x32x256xbf16, #tpu.memory_space<vmem>>, vector<1x32x256xbf16>
    %1 = vector.shape_cast %0 : vector<1x32x256xbf16> to vector<32x256xbf16>
    %c0_2 = arith.constant 0 : index
    %c0_3 = arith.constant 0 : index
    %c0_4 = arith.constant 0 : index
    %2 = vector.load %arg3[%c0_2, %c0_3, %c0_4] : memref<1x32x256xbf16, #tpu.memory_space<vmem>>, vector<1x32x256xbf16>
    %3 = vector.shape_cast %2 : vector<1x32x256xbf16> to vector<32x256xbf16>
    %cst = arith.constant dense<0.000000e+00> : vector<256x256xf32>
    %4 = tpu.matmul %3, %1, %cst {dimension_numbers = #tpu.dot_dimension_numbers<[0], [0], [1], [1], [0, 1, 1, 1], [], []>} : vector<32x256xbf16>, vector<32x256xbf16>, vector<256x256xf32> -> vector<256x256xf32>
    %cst_5 = arith.constant dense<0xFF800000> : vector<256xf32>
    %5 = vector.multi_reduction <maximumf>, %4, %cst_5 [0] : vector<256x256xf32> to vector<256xf32>
    %6 = vector.shape_cast %5 : vector<256xf32> to vector<1x256xf32>
    %7 = vector.broadcast %6 : vector<1x256xf32> to vector<256x256xf32>
    %8 = arith.subf %4, %7 : vector<256x256xf32>
    %9 = arith.truncf %8 : vector<256x256xf32> to vector<256x256xbf16>
    %10 = math.exp %9 : vector<256x256xbf16>
    %c0_6 = arith.constant 0 : index
    %c0_7 = arith.constant 0 : index
    %c0_8 = arith.constant 0 : index
    %11 = vector.load %arg4[%c0_6, %c0_7, %c0_8] : memref<1x33x256xbf16, #tpu.memory_space<vmem>>, vector<1x33x256xbf16>
    %12 = vector.shape_cast %11 : vector<1x33x256xbf16> to vector<33x256xbf16>
    %cst_9 = arith.constant dense<0.000000e+00> : vector<33x256xf32>
    %13 = tpu.matmul %12, %10, %cst_9 {dimension_numbers = #tpu.dot_dimension_numbers<[1], [0], [0], [1], [0, 0, 1, 1], [], []>} : vector<33x256xbf16>, vector<256x256xbf16>, vector<33x256xf32> -> vector<33x256xf32>
    %14 = vector.extract_strided_slice %13 {offsets = [32, 0], sizes = [1, 256], strides = [1, 1]} : vector<33x256xf32> to vector<1x256xf32>
    %15 = tpu.reciprocal %14 : vector<1x256xf32> -> vector<1x256xf32>
    %16 = vector.extract_strided_slice %13 {offsets = [0, 0], sizes = [32, 256], strides = [1, 1]} : vector<33x256xf32> to vector<32x256xf32>
    %17 = vector.broadcast %15 : vector<1x256xf32> to vector<32x256xf32>
    %18 = arith.mulf %16, %17 : vector<32x256xf32>
    %c0_10 = arith.constant 0 : index
    %c0_11 = arith.constant 0 : index
    %c0_12 = arith.constant 0 : index
    %19 = vector.load %arg5[%c0_10, %c0_11, %c0_12] : memref<1x32x256xf32, #tpu.memory_space<vmem>>, vector<1x32x256xf32>
    %20 = vector.shape_cast %19 : vector<1x32x256xf32> to vector<32x256xf32>
    %21 = arith.addf %18, %20 : vector<32x256xf32>
    %c0_13 = arith.constant 0 : index
    %c0_14 = arith.constant 0 : index
    %c0_15 = arith.constant 0 : index
    %22 = vector.load %arg6[%c0_13, %c0_14, %c0_15] : memref<1x32x256xf32, #tpu.memory_space<vmem>>, vector<1x32x256xf32>
    %23 = vector.shape_cast %22 : vector<1x32x256xf32> to vector<32x256xf32>
    %24 = vector.shape_cast %21 : vector<32x256xf32> to vector<1x32x256xf32>
    tpu.vector_store %arg6[%c0_13, %c0_14, %c0_15], %24 {strides = array<i32>} : memref<1x32x256xf32, #tpu.memory_space<vmem>>, vector<1x32x256xf32>,
    return
  }
  func.func @transform_0(%arg0: i32, %arg1: i32) -> (i32, i32, i32) {
    %c0_i32 = arith.constant 0 : i32
    %c0_i32_0 = arith.constant 0 : i32
    return %arg0, %c0_i32, %arg1 : i32, i32, i32
  }
  func.func @transform_1(%arg0: i32, %arg1: i32) -> (i32, i32, i32) {
    %c0_i32 = arith.constant 0 : i32
    %c0_i32_0 = arith.constant 0 : i32
    %c0_i32_1 = arith.constant 0 : i32
    return %arg0, %c0_i32, %c0_i32_0 : i32, i32, i32
  }
  func.func @transform_2(%arg0: i32, %arg1: i32) -> (i32, i32, i32) {
    %c0_i32 = arith.constant 0 : i32
    %c0_i32_0 = arith.constant 0 : i32
    %c0_i32_1 = arith.constant 0 : i32
    return %arg0, %c0_i32, %c0_i32_0 : i32, i32, i32
  }
  func.func @transform_3(%arg0: i32, %arg1: i32) -> (i32, i32, i32) {
    %c0_i32 = arith.constant 0 : i32
    %c0_i32_0 = arith.constant 0 : i32
    return %arg0, %c0_i32, %arg1 : i32, i32, i32
  }
  func.func @transform_4(%arg0: i32, %arg1: i32) -> (i32, i32, i32) {
    %c0_i32 = arith.constant 0 : i32
    %c0_i32_0 = arith.constant 0 : i32
    return %arg0, %c0_i32, %arg1 : i32, i32, i32
  }
}

</mosaic_0001>

<bundles_post_ra>
// kernel: tpu_custom_call.1
= control target key start
LH: loop header
LB: loop body
LE: loop exit
PB: predicated region body
PF: predicated region fallthrough
CT: control target
= control target key end

     0   :  { %s2490_s0 = inlined_call_operand.hbm [shape: bf16[2,32,256], index: 0, kind: input, shape index: {}]   ;;  %s2491_s1 = inlined_call_operand.hbm [shape: bf16[2,32,256], index: 1, kind: input, shape index: {}]   ;;  %s2492_s2 = inlined_call_operand.hbm [shape: bf16[2,33,256], index: 2, kind: input, shape index: {}]   ;;  %s2493_s3 = inlined_call_operand.hbm [shape: f32[2,32,256], index: 3, kind: input, shape index: {}]   ;;  %s2494_s4 = inlined_call_operand.hbm [shape: f32[2,32,256], index: 4, kind: output, shape index: {}]  }
   0x1   :  { %2530 = sst [smem:[#allocation45_spill]] %s2490_s0 }
   0x2   :  { %2531 = sst [smem:[#allocation46_spill]] %s2491_s1 }
   0x3   :  { %9 = vsyncpa [#allocation3], 0 }
   0x4   :  { %11 = vsyncpa [#allocation3 + $0x1], 0 }
   0x5   :  { %12 = vsyncpa [#allocation6], 0 }
   0x6   :  { %14 = vsyncpa [#allocation6 + $0x1], 0 }
   0x7   :  { %15 = vsyncpa [#allocation9], 0 }
   0x8   :  { %17 = vsyncpa [#allocation9 + $0x1], 0 }
   0x9   :  { %18 = vsyncpa [#allocation4], 0 }
   0xa   :  { %20 = vsyncpa [#allocation4 + $0x1], 0  ;;  %s1736_s15 = smov 0   ;;  %s1738_s16 = smov 0  }
   0xb   :  { %s1740_s17 = smov 0   ;;  %s1742_s18 = smov 0  }
   0xc   :  { %s1744_s19 = smov 0   ;;  %s1746_s20 = smov 0  }
   0xd LB: > { %2532 = sst [smem:[#allocation15_spill]] %s1685_s17  ;;  %s1767_s21 = sadd.s32 4294967295, %s1697_s20   ;;  %s1697_s20 = sphi %s1746_s20, %s26_s20   ;;  %s1693_s19 = sphi %s1744_s19, %s2621_s19   ;;  %s1689_s18 = sphi %s1742_s18, %s2620_s18   ;;  %s1685_s17 = sphi %s1740_s17, %s2616_s17   ;;  %s1681_s16 = sphi %s1738_s16, %s2619_s16   ;;  %s1677_s15 = sphi %s1736_s15, %s2618_s15  }
   0xe   : > { %s1255_s22 = sadd.s32 4294967294, %s1697_s20   ;;  %s38_s23 = sadd.s32 1, %s1693_s19 }
   0xf   : > { %s47_s24 = sadd.s32 1, %s1685_s17  ;;  %p40_p0 = scmp.ge.s32.totalorder %s38_s23, 2 }
  0x10   : > { %p54_p1 = scmp.ne.s32.totalorder %s1685_s17, %s1681_s16  ;;  %p55_p2 = scmp.eq.s32.totalorder %s1697_s20, 0 }
  0x11   : > { %p60_p3 = scmp.ne.s32.totalorder %s1681_s16, %s1677_s15  ;;  %s2623_s23 = smov (%p40_p0, %s38_s23), 0 }
  0x12   : > { %2533 = sst [smem:[#allocation16_spill]] %s2623_s23  ;;  %p1779_p4 = por %p55_p2, %p54_p1 }
  0x13   : > { %p61_p5 = scmp.eq.s32.totalorder %s1767_s21, 0  ;;  %s42_s26 = ssub.s32 %s1693_s19, %s2623_s23 }
  0x14   : > { %p166_p6 = scmp.eq.s32.totalorder %s1767_s21, 1  ;;  %p45_p7 = scmp.eq.s32.totalorder %s42_s26, 0 }
  0x15   : > { %p1787_p8 = por %p61_p5, %p60_p3  ;;  %p172_p10 = scmp.eq.s32.totalorder %s1255_s22, 1 }
  0x16   : > { %p1791_p9 = por %p166_p6, %p54_p1  ;;  %p1342_p13 = scmp.lt.s32.totalorder %s1697_s20, 2 }
  0x17   : > { %s2535_s27 = scalar_select %p1787_p8, 1, 0 }
  0x18   : > { %s2536_s28 = scalar_select %p1791_p9, 1, 0 }
  0x19   : > { %s1796_s29 = scalar_select %p45_p7, %s1685_s17, %s47_s24  }
  0x1a   : > { %p1798_p11 = por %p172_p10, %p60_p3  ;;  %s1805_s5 = sand.u32 1, %s1685_s17  }
  0x1b   : > { %2537 = sst [smem:[#allocation17_spill]] %s1796_s29  ;;  %s2495_s6 = sshll.u32 %s1805_s5, 5 }
  0x1c   : > { %s2538_s30 = scalar_select %p1798_p11, 1, 0 }
  0x1d   : > { %s1308_s7 = sshll.u32 %s1693_s19, 9  ;;  %p1811_p0 = pnand %p1342_p13, %p1779_p4 }
  0x1e   : > { %s215_s9 = sand.u32 1, %s1697_s20   ;;  %s2540_s1 = sld [smem:[#allocation46_spill]] }
  0x1f   : > { %s219_s13 = scalar_lea.vmem [#allocation5], %s2495_s6  ;;  %s1829_s22 = scalar_lea.sflag [#allocation6], %s215_s9 }
  0x20   : > { %s226_s14 = sshll.u32 %s219_s13, 4  ;;  %p1835_p4 = pneg %p1811_p0  ;;  %s1826_s14 = int_to_ptr.vmem [resolvable:$true] %s226_s14 }
  0x24   : > { %s1821_s12 = scalar_lea.hbm %s2540_s1, %s1308_s7  ;;  %s1492_s11 = scalar_lea.hbm %s2540_s1, 1024 }
  0x25   : > { %s1487_s24 = scalar_lea.hbm %s1821_s12, 512  ;;  %p1493_p7 = scmp.lt.u32.totalorder %s1821_s12, %s2540_s1 }
  0x26   : > { %p1488_p3 = scmp.ne.s32.totalorder %s1821_s12, %s1487_s24  ;;  %p1494_p10 = scmp.lt.u32.totalorder %s1492_s11, %s1487_s24 }
  0x27   : > { %p1496_p12 = scmp.lt.u32.totalorder %s1487_s24, %s1821_s12 }
  0x28   : > { %p1490_p5 = pnand %p1835_p4, %p1488_p3  ;;  %p1495_p13 = por %p1494_p10, %p1493_p7 }
  0x2a   : > { %p1491_p6 = pneg %p1490_p5  ;;  %p1497_p1 = por %p1496_p12, %p1495_p13 }
  0x2c   : > { %p1498_p2 = pnand %p1497_p1, %p1491_p6 }
  0x2e   : > { %1501 = shalt.err (!%p1498_p2)
}
  0x2f   : > { %s1502_s9 = scalar_lea.vmem %s1826_s14, 512  ;;  %s1699_s26 = smov [#allocation5]  }
  0x30   : > { %p1503_p3 = scmp.ne.s32.totalorder %s1826_s14, %s1502_s9  ;;  %s1507_s10 = sshll.u32 %s1699_s26, 4  ;;  %s1508_s10 = int_to_ptr.vmem [resolvable:$false] %s1507_s10 }
  0x31   : > { %s1509_s6 = scalar_lea.vmem %s1508_s10, 1024  ;;  %p1510_p9 = scmp.lt.s32.totalorder %s1826_s14, %s1508_s10 }
  0x32   : > { %p1505_p5 = pnand %p1503_p3, %p1835_p4  ;;  %p1511_p8 = scmp.lt.s32.totalorder %s1509_s6, %s1502_s9 }
  0x34   : > { %p1506_p11 = pneg %p1505_p5  ;;  %p1512_p7 = por %p1511_p8, %p1510_p9 }
  0x36   : > { %p1513_p10 = pnand %p1512_p7, %p1506_p11 }
  0x38   : > { %1516 = shalt.err (!%p1513_p10)
}
  0x39   : > { %s2499_s24 = smov 128   ;;  %s2501_s11 = smov 8  }
  0x3a   : > { %1331 = dma.hbm_to_vmem [thread:$0]  (!%p1811_p0), %s1821_s12, 512, %s1826_s14, %s1829_s22, %s2499_s24, %s2499_s24, %s2501_s11  }
  0x3b   : > { %p2542_p8 = scmp.lt.s32.totalorder %s1697_s20, 3  ;;  %p2543_p9 = scmp.ge.s32.totalorder %s1697_s20, 1 }
  0x3c   : > { %s2545_s0 = sld [smem:[#allocation45_spill]]  ;;  %s2546_s6 = sshll.u32 %s1805_s5, 5 }
  0x3d   : > { %p1866_p11 = pnand %p2543_p9, %p2542_p8  ;;  %s196_s1 = scalar_lea.vmem [#allocation2], %s2546_s6 }
  0x3e   : > { %s205_s23 = sshll.u32 %s196_s1, 4  ;;  %s1312_s12 = smul.u32 40, %s1805_s5  ;;  %s1880_s23 = int_to_ptr.vmem [resolvable:$true] %s205_s23 }
  0x3f   : > { %s2544_s13 = scalar_select %p1866_p11, 1, 0 }
  0x40   : > { %s1313_s14 = smul.u32 640, %s1693_s19  ;;  %s193_s24 = scalar_lea.sflag [#allocation3], %s1805_s5 }
  0x42   : > { %s1875_s10 = scalar_lea.hbm %s2545_s0, %s1308_s7  ;;  %s1522_s26 = scalar_lea.hbm %s2545_s0, 1024 }
  0x43   : > { %s1517_s11 = scalar_lea.hbm %s1875_s10, 512  ;;  %p1523_p6 = scmp.lt.u32.totalorder %s1875_s10, %s2545_s0 }
  0x44   : > { %p1518_p12 = scmp.ne.s32.totalorder %s1875_s10, %s1517_s11  ;;  %p1524_p13 = scmp.lt.u32.totalorder %s1522_s26, %s1517_s11 }
  0x45   : > { %p1526_p5 = scmp.lt.u32.totalorder %s1517_s11, %s1875_s10 }
  0x46   : > { %p1520_p1 = pnand %p1518_p12, %p1835_p4  ;;  %p1525_p3 = por %p1524_p13, %p1523_p6 }
  0x48   : > { %p1521_p2 = pneg %p1520_p1  ;;  %p1527_p7 = por %p1526_p5, %p1525_p3 }
  0x4a   : > { %p1528_p10 = pnand %p1527_p7, %p1521_p2 }
  0x4c   : > { %1531 = shalt.err (!%p1528_p10)
}
  0x4d   : > { %s1532_s1 = scalar_lea.vmem %s1880_s23, 512  ;;  %s1702_s6 = smov [#allocation2]  }
  0x4e   : > { %p1533_p8 = scmp.ne.s32.totalorder %s1880_s23, %s1532_s1  ;;  %s1537_s9 = sshll.u32 %s1702_s6, 4  ;;  %s1538_s9 = int_to_ptr.vmem [resolvable:$false] %s1537_s9 }
  0x4f   : > { %s1539_s17 = scalar_lea.vmem %s1538_s9, 1024  ;;  %p1540_p1 = scmp.lt.s32.totalorder %s1880_s23, %s1538_s9 }
  0x50   : > { %p1535_p9 = pnand %p1533_p8, %p1835_p4  ;;  %p1541_p11 = scmp.lt.s32.totalorder %s1539_s17, %s1532_s1 }
  0x52   : > { %p1536_p12 = pneg %p1535_p9  ;;  %p1542_p6 = por %p1541_p11, %p1540_p1 }
  0x54   : > { %p1543_p13 = pnand %p1542_p6, %p1536_p12 }
  0x56   : > { %1546 = shalt.err (!%p1543_p13)
}
  0x57   : > { %s2547_s29 = smov 8   ;;  %s2548_s11 = smov 128  }
  0x58   : > { %1328 = dma.hbm_to_vmem [thread:$0]  (!%p1811_p0), %s1875_s10, 512, %s1880_s23, %s193_s24, %s2548_s11, %s2548_s11, %s2547_s29  }
  0x59   : > { %s1915_s1 = scalar_lea.hbm %s2492_s2, %s1313_s14  ;;  %s240_s6 = scalar_lea.vmem [#allocation7], %s1312_s12 }
  0x5a   : > { %s247_s9 = sshll.u32 %s240_s6, 4  ;;  %s1265_s17 = sshll.u32 %s1805_s5, 6  ;;  %s1919_s9 = int_to_ptr.vmem [resolvable:$true] %s247_s9 }
  0x5b   : > { %s1547_s0 = scalar_lea.hbm %s1915_s1, 640  ;;  %s1552_s10 = scalar_lea.hbm %s2492_s2, 1280 }
  0x5c   : > { %p1548_p11 = scmp.ne.s32.totalorder %s1915_s1, %s1547_s0  ;;  %p1553_p5 = scmp.lt.u32.totalorder %s1915_s1, %s2492_s2 }
  0x5d   : > { %p1554_p7 = scmp.lt.u32.totalorder %s1552_s10, %s1547_s0  ;;  %p1556_p8 = scmp.lt.u32.totalorder %s1547_s0, %s1915_s1 }
  0x5e   : > { %p1550_p2 = pnand %p1548_p11, %p1835_p4 }
  0x5f   : > { %p1555_p10 = por %p1554_p7, %p1553_p5 }
  0x60   : > { %p1551_p3 = pneg %p1550_p2 }
  0x61   : > { %p1557_p9 = por %p1556_p8, %p1555_p10 }
  0x63   : > { %p1558_p12 = pnand %p1557_p9, %p1551_p3 }
  0x65   : > { %1561 = shalt.err (!%p1558_p12)
}
  0x66   : > { %s1562_s12 = scalar_lea.vmem %s1919_s9, 640  ;;  %s1703_s26 = smov [#allocation7]  }
  0x67   : > { %p1563_p1 = scmp.ne.s32.totalorder %s1919_s9, %s1562_s12  ;;  %s1567_s6 = sshll.u32 %s1703_s26, 4  ;;  %s1568_s6 = int_to_ptr.vmem [resolvable:$false] %s1567_s6 }
  0x68   : > { %s1569_s23 = scalar_lea.vmem %s1568_s6, 1280  ;;  %p1570_p11 = scmp.lt.s32.totalorder %s1919_s9, %s1568_s6 }
  0x69   : > { %p1565_p6 = pnand %p1563_p1, %p1835_p4  ;;  %p1571_p2 = scmp.lt.s32.totalorder %s1569_s23, %s1562_s12 }
  0x6b   : > { %p1566_p13 = pneg %p1565_p6  ;;  %p1572_p5 = por %p1571_p2, %p1570_p11 }
  0x6d   : > { %p1573_p7 = pnand %p1572_p5, %p1566_p13 }
  0x6f   : > { %1576 = shalt.err (!%p1573_p7)
}
  0x70   : > { %1334 = dma.hbm_to_vmem [thread:$0]  (!%p1811_p0), %s1915_s1, 640, %s1919_s9, %s1829_s22, %s2548_s11, %s2548_s11, %s2547_s29  }
  0x71   : > { %s1310_s0 = sshll.u32 %s1693_s19, 10  ;;  %s261_s7 = scalar_lea.vmem [#allocation8], %s1265_s17 }
  0x72   : > { %s1951_s14 = scalar_lea.hbm %s2493_s3, %s1310_s0  ;;  %s270_s12 = sshll.u32 %s261_s7, 4  ;;  %s1955_s12 = int_to_ptr.vmem [resolvable:$true] %s270_s12 }
  0x73   : > { %s258_s26 = scalar_lea.sflag [#allocation9], %s1805_s5  ;;  %s1577_s6 = scalar_lea.hbm %s1951_s14, 1024 }
  0x74   : > { %p1578_p3 = scmp.ne.s32.totalorder %s1951_s14, %s1577_s6  ;;  %s1582_s11 = scalar_lea.hbm %s2493_s3, 2048 }
  0x75   : > { %p1583_p9 = scmp.lt.u32.totalorder %s1951_s14, %s2493_s3  ;;  %p1584_p12 = scmp.lt.u32.totalorder %s1582_s11, %s1577_s6 }
  0x76   : > { %p1580_p10 = pnand %p1578_p3, %p1835_p4  ;;  %p1586_p6 = scmp.lt.u32.totalorder %s1577_s6, %s1951_s14 }
  0x77   : > { %p1585_p1 = por %p1584_p12, %p1583_p9 }
  0x78   : > { %p1581_p8 = pneg %p1580_p10 }
  0x79   : > { %p1587_p13 = por %p1586_p6, %p1585_p1 }
  0x7b   : > { %p1588_p11 = pnand %p1587_p13, %p1581_p8 }
  0x7d   : > { %1591 = shalt.err (!%p1588_p11)
}
  0x7e   : > { %s1592_s17 = scalar_lea.vmem %s1955_s12, 1024  ;;  %s1704_s23 = smov [#allocation8]  }
  0x7f   : > { %p1593_p2 = scmp.ne.s32.totalorder %s1955_s12, %s1592_s17  ;;  %s1597_s0 = sshll.u32 %s1704_s23, 4  ;;  %s1598_s0 = int_to_ptr.vmem [resolvable:$false] %s1597_s0 }
  0x80   : > { %s1599_s24 = scalar_lea.vmem %s1598_s0, 2048  ;;  %p1600_p3 = scmp.lt.s32.totalorder %s1955_s12, %s1598_s0 }
  0x81   : > { %p1595_p5 = pnand %p1593_p2, %p1835_p4  ;;  %p1601_p10 = scmp.lt.s32.totalorder %s1599_s24, %s1592_s17 }
  0x83   : > { %p1596_p7 = pneg %p1595_p5  ;;  %p1602_p9 = por %p1601_p10, %p1600_p3 }
  0x85   : > { %p1603_p12 = pnand %p1602_p9, %p1596_p7 }
  0x87   : > { %1606 = shalt.err (!%p1603_p12)
}
  0x88   : > { %s1705_s10 = smov 256   ;;  %s1706_s7 = smov 16  }
  0x89   : > { %1337 = dma.hbm_to_vmem [thread:$0]  (!%p1811_p0), %s1951_s14, 1024, %s1955_s12, %s258_s26, %s1705_s10, %s1705_s10, %s1706_s7  }
  0x8a   : > { %p2549_p4 = scmp.ne.s32.totalorder %s2544_s13, 0 }
  0x8c   : > { %282 = sbr.rel (%p2549_p4) target bundleno = 977 (0x3d1), region = 36 }
  0x93   : > { %s1984_s25 = sand.u32 1, %s1681_s16   ;;  %p2550_p8 = scmp.ne.s32.totalorder %s2535_s27, 0 }
  0x94   : > { %s1269_s6 = sshll.u32 %s1984_s25, 5  ;;  %s285_s22 = scalar_lea.sflag [#allocation3], %s1984_s25 }
  0x95   : > { %s288_s29 = scalar_lea.vmem [#allocation2], %s1269_s6 }
  0x96   : > { %1660 = dma.done.wait (%p2550_p8), %s285_s22, 512  }
  0x97   : > { %1662 = vsyncadd (%p2550_p8), %s285_s22, 4294966784  ;;  %s293_s5 = sand.u32 1, %s1767_s21   ;;  %s297_s13 = scalar_lea.vmem [#allocation5], %s1269_s6 }
  0x98   : > { %s294_s8 = scalar_lea.sflag [#allocation6], %s293_s5 }
  0x99   : > { %1664 = dma.done.wait (%p2550_p8), %s294_s8, 1152  }
  0x9a   : > { %1666 = vsyncadd (%p2550_p8), %s294_s8, 4294966144  ;;  %s1314_s14 = smul.u32 40, %s1984_s25  ;;  %s1271_s12 = sshll.u32 %s1984_s25, 6 }
  0x9b   : > { %s312_s11 = scalar_lea.sflag [#allocation9], %s1984_s25  ;;  %s2004_s1 = scalar_lea.vmem [#allocation8], %s1271_s12 }
  0x9c   : > { %s1999_s26 = scalar_lea.vmem [#allocation7], %s1314_s14 }
  0x9d   : > { %1668 = dma.done.wait (%p2550_p8), %s312_s11, 1024  }
  0x9e   : > { %1670 = vsyncadd (%p2550_p8), %s312_s11, 4294966272  ;;  %v1707_v0 = vmov 0   ;;  %v1399_v1 = vld [vmem:[%s297_s13] ss:$8 sps:$4 sm:$0xff]   ;;  %v1401_v2 = vld [vmem:[%s297_s13 + $0x10] ss:$8 sps:$4 sm:$0xff]  }
  0x9f   : > { %520 = vmatprep.mubr.bf16.mxu0 %v1707_v0  ;;  %387 = vxpose.xlu0.c.b16.start [1/2] (short) %v1399_v1, 128  ;;  %v1403_v3 = vld [vmem:[%s297_s13 + $0x4] ss:$8 sps:$4 sm:$0xff]   ;;  %v1404_v4 = vld [vmem:[%s297_s13 + $0x14] ss:$8 sps:$4 sm:$0xff]   ;;  %v1407_v6 = vld [vmem:[%s288_s29] ss:$8 sps:$4 sm:$0xff]  }
  0xa0   : > { %v1405_v5 = vld [vmem:[%s288_s29 + $0x4] ss:$8 sps:$4 sm:$0xff]   ;;  %403 = vxpose.xlu1.c.b16.start [1/2] (short) %v1403_v3, 128  ;;  %v1408_v7 = vld [vmem:[%s288_s29 + $0x14] ss:$8 sps:$4 sm:$0xff]   ;;  %v1410_v8 = vld [vmem:[%s288_s29 + $0x10] ss:$8 sps:$4 sm:$0xff]  }
  0xa1   : > { %488 = vmatprep.subr.bf16.mxu0 %v1405_v5  ;;  %vm439_vm0 = vcmask 261120   ;;  %s1311_s21 = sshll.u32 %s1689_s18, 10  ;;  %s354_s27 = scalar_lea.vmem [#allocation10], %s1271_s12 }
  0xa2   : > { %489 = vmatpush1.bf16.msra.mxu0 %v1407_v6  ;;  %s1098_s9 = sshll.u32 %s354_s27, 4  ;;  %s2439_s23 = scalar_lea.hbm %s2494_s4, %s1311_s21  ;;  %s2441_s9 = int_to_ptr.vmem [resolvable:$true] %s1098_s9 }
  0xa3   : > { %388 = vxpose.xlu0.c.b16.end [2/2] (short) %v1401_v2, 128  ;;  %490 = vmatprep.subr.bf16.mxu0 %v1408_v7  ;;  %s1083_s0 = scalar_lea.sflag [#allocation4], %s1984_s25  ;;  %s1607_s24 = scalar_lea.vmem %s2441_s9, 1024 }
  0xa4   : > { %404 = vxpose.xlu1.c.b16.end [2/2] (short) %v1404_v4, 128  ;;  %p1608_p0 = scmp.ne.s32.totalorder %s2441_s9, %s1607_s24  ;;  %p2612_p1 = scmp.ne.s32.totalorder %s2536_s28, 0 }
  0xa5   : > { %s1708_s10 = smov [#allocation10]  }
  0xa6   : > { %491 = vmatpush1.bf16.msra.mxu0 %v1410_v8  ;;  %p1609_p6 = pnand %p1608_p0, %p2612_p1  ;;  %s1611_s7 = sshll.u32 %s1708_s10, 4  ;;  %s1612_s7 = int_to_ptr.vmem [resolvable:$false] %s1611_s7 }
  0xa7   : > { %s1613_s6 = scalar_lea.vmem %s1612_s7, 2048  ;;  %p1614_p11 = scmp.lt.s32.totalorder %s2441_s9, %s1612_s7 }
  0xa8   : > { %p1610_p13 = pneg %p1609_p6  ;;  %p1615_p2 = scmp.lt.s32.totalorder %s1613_s6, %s1607_s24 }
  0xaa   : > { %p1616_p5 = por %p1615_p2, %p1614_p11 }
  0xac   : > { %p1617_p7 = pnand %p1616_p5, %p1610_p13 }
 0x105   : > { %v395_v9 = vpop.trf.xlu0 }
 0x106   : > { %1281 = vmatmul.mubr.msk.bf16.vlgmr.msra.gmra.mrb[0].mxu0 %vm439_vm0, %v395_v9  ;;  %v411_v17 = vpop.trf.xlu1 }
 0x107   : > { %530 = vmatprep.mubr.bf16.mxu0 %v1707_v0 }
 0x109   : > { %v396_v10 = vpop.trf.xlu0 }
 0x10a   : > { %v412_v18 = vpop.trf.xlu1 }
 0x10d   : > { %v397_v11 = vpop.trf.xlu0 }
 0x10e   : > { %1282 = vmatmul.mubr.msk.bf16.gmra.mrb[4].mxu0 %vm439_vm0, %v396_v10  ;;  %v413_v19 = vpop.trf.xlu1 }
 0x10f   : > { %540 = vmatprep.mubr.bf16.mxu0 %v1707_v0 }
 0x111   : > { %v398_v12 = vpop.trf.xlu0 }
 0x112   : > { %v414_v20 = vpop.trf.xlu1 }
 0x115   : > { %v399_v13 = vpop.trf.xlu0 }
 0x116   : > { %1283 = vmatmul.mubr.msk.bf16.gmra.mrb[8].mxu0 %vm439_vm0, %v397_v11  ;;  %v415_v21 = vpop.trf.xlu1 }
 0x117   : > { %550 = vmatprep.mubr.bf16.mxu0 %v1707_v0 }
 0x119   : > { %v400_v14 = vpop.trf.xlu0 }
 0x11a   : > { %v416_v22 = vpop.trf.xlu1 }
 0x11d   : > { %v401_v15 = vpop.trf.xlu0 }
 0x11e   : > { %1284 = vmatmul.mubr.msk.bf16.gmra.mrb[12].mxu0 %vm439_vm0, %v398_v12  ;;  %v417_v23 = vpop.trf.xlu1 }
 0x11f   : > { %560 = vmatprep.mubr.bf16.mxu0 %v1707_v0 }
 0x121   : > { %v402_v16 = vpop.trf.xlu0 }
 0x122   : > { %v418_v24 = vpop.trf.xlu1 }
 0x126   : > { %1285 = vmatmul.mubr.msk.bf16.gmra.mrb[16].mxu0 %vm439_vm0, %v399_v13 }
 0x127   : > { %570 = vmatprep.mubr.bf16.mxu0 %v1707_v0 }
 0x12e   : > { %1286 = vmatmul.mubr.msk.bf16.gmra.mrb[20].mxu0 %vm439_vm0, %v400_v14 }
 0x12f   : > { %580 = vmatprep.mubr.bf16.mxu0 %v1707_v0 }
 0x136   : > { %1287 = vmatmul.mubr.msk.bf16.gmra.mrb[24].mxu0 %vm439_vm0, %v401_v15 }
 0x137   : > { %590 = vmatprep.mubr.bf16.mxu0 %v1707_v0 }
 0x13e   : > { %1288 = vmatmul.mubr.msk.bf16.gmra.mrb[28].mxu0 %vm439_vm0, %v402_v16 }
 0x13f   : > { %600 = vmatprep.mubr.bf16.mxu0 %v1707_v0 }
 0x146   : > { %1289 = vmatmul.mubr.msk.bf16.gmra.mrb[32].mxu0 %vm439_vm0, %v411_v17 }
 0x147   : > { %610 = vmatprep.mubr.bf16.mxu0 %v1707_v0 }
 0x14e   : > { %1290 = vmatmul.mubr.msk.bf16.gmra.mrb[36].mxu0 %vm439_vm0, %v412_v18 }
 0x14f   : > { %620 = vmatprep.mubr.bf16.mxu0 %v1707_v0 }
 0x156   : > { %1291 = vmatmul.mubr.msk.bf16.gmra.mrb[40].mxu0 %vm439_vm0, %v413_v19 }
 0x157   : > { %630 = vmatprep.mubr.bf16.mxu0 %v1707_v0 }
 0x15e   : > { %1292 = vmatmul.mubr.msk.bf16.gmra.mrb[44].mxu0 %vm439_vm0, %v414_v20 }
 0x15f   : > { %640 = vmatprep.mubr.bf16.mxu0 %v1707_v0 }
 0x166   : > { %1293 = vmatmul.mubr.msk.bf16.gmra.mrb[48].mxu0 %vm439_vm0, %v415_v21 }
 0x167   : > { %650 = vmatprep.mubr.bf16.mxu0 %v1707_v0 }
 0x16e   : > { %1294 = vmatmul.mubr.msk.bf16.gmra.mrb[52].mxu0 %vm439_vm0, %v416_v22 }
 0x16f   : > { %660 = vmatprep.mubr.bf16.mxu0 %v1707_v0 }
 0x176   : > { %1295 = vmatmul.mubr.msk.bf16.gmra.mrb[56].mxu0 %vm439_vm0, %v417_v23 }
 0x177   : > { %670 = vmatprep.mubr.bf16.mxu0 %v1707_v0 }
 0x17e   : > { %1296 = vmatmul.mubr.msk.bf16.gmra.mrb[60].mxu0 %vm439_vm0, %v418_v24 }
 0x1d9   : > { %v2042_v25 = vpop.f32.mrb[0].mxu0 }
 0x1da   : > { %v2044_v26 = vpop.f32.mrb[1].mxu0 }
 0x1db   : > { %v2046_v27 = vpop.f32.mrb[2].mxu0 }
 0x1dc   : > { %2551 = vst [vmem:[#allocation18_spill] sm:$0xff] %v2046_v27  ;;  %v2048_v28 = vpop.f32.mrb[3].mxu0 }
 0x1e1   : > { %v2050_v29 = vpop.f32.mrb[4].mxu0 }
 0x1e2   : > { %2552 = vst [vmem:[#allocation19_spill] sm:$0xff] %v2050_v29  ;;  %v681_v30 = vmax.f32 %v2042_v25, %v2050_v29  ;;  %v2054_v31 = vpop.f32.mrb[5].mxu0 }
 0x1e3   : > { %v718_v32 = vmax.f32 %v2044_v26, %v2054_v31  ;;  %v2058_v33 = vpop.f32.mrb[6].mxu0 }
 0x1e4   : > { %2553 = vst [vmem:[#allocation20_spill] sm:$0xff] %v2058_v33  ;;  %v682_v34 = vmax.f32 %v2046_v27, %v2058_v33  ;;  %v2062_v35 = vpop.f32.mrb[7].mxu0 }
 0x1e5   : > { %v719_v36 = vmax.f32 %v2048_v28, %v2062_v35 }
 0x1e9   : > { %v2066_v37 = vpop.f32.mrb[8].mxu0 }
 0x1ea   : > { %2554 = vst [vmem:[#allocation21_spill] sm:$0xff] %v2066_v37  ;;  %v683_v38 = vmax.f32 %v681_v30, %v2066_v37  ;;  %v2069_v39 = vpop.f32.mrb[9].mxu0 }
 0x1eb   : > { %v720_v40 = vmax.f32 %v718_v32, %v2069_v39  ;;  %v2072_v41 = vpop.f32.mrb[10].mxu0 }
 0x1ec   : > { %v684_v42 = vmax.f32 %v682_v34, %v2072_v41  ;;  %v2075_v43 = vpop.f32.mrb[11].mxu0 }
 0x1ed   : > { %v721_v44 = vmax.f32 %v719_v36, %v2075_v43 }
 0x1f1   : > { %v2078_v45 = vpop.f32.mrb[12].mxu0 }
 0x1f2   : > { %v685_v46 = vmax.f32 %v683_v38, %v2078_v45  ;;  %v2081_v47 = vpop.f32.mrb[13].mxu0 }
 0x1f3   : > { %v722_v48 = vmax.f32 %v720_v40, %v2081_v47  ;;  %v2084_v49 = vpop.f32.mrb[14].mxu0 }
 0x1f4   : > { %v686_v50 = vmax.f32 %v684_v42, %v2084_v49  ;;  %v2087_v51 = vpop.f32.mrb[15].mxu0 }
 0x1f5   : > { %v723_v52 = vmax.f32 %v721_v44, %v2087_v51 }
 0x1f9   : > { %v2090_v53 = vpop.f32.mrb[16].mxu0 }
 0x1fa   : > { %v687_v54 = vmax.f32 %v685_v46, %v2090_v53  ;;  %v2093_v55 = vpop.f32.mrb[17].mxu0 }
 0x1fb   : > { %v724_v56 = vmax.f32 %v722_v48, %v2093_v55  ;;  %v2096_v57 = vpop.f32.mrb[18].mxu0 }
 0x1fc   : > { %v688_v58 = vmax.f32 %v686_v50, %v2096_v57  ;;  %v2099_v59 = vpop.f32.mrb[19].mxu0 }
 0x1fd   : > { %v725_v60 = vmax.f32 %v723_v52, %v2099_v59 }
 0x201   : > { %v2102_v61 = vpop.f32.mrb[20].mxu0 }
 0x202   : > { %v689_v62 = vmax.f32 %v687_v54, %v2102_v61  ;;  %v2105_v63 = vpop.f32.mrb[21].mxu0 }
 0x203   : > { %2555 = vst [vmem:[#allocation22_spill] sm:$0xff] %v2105_v63  ;;  %v726_v0 = vmax.f32 %v724_v56, %v2105_v63  ;;  %v2108_v1 = vpop.f32.mrb[22].mxu0 }
 0x204   : > { %v690_v2 = vmax.f32 %v688_v58, %v2108_v1  ;;  %v2111_v3 = vpop.f32.mrb[23].mxu0 }
 0x205   : > { %2556 = vst [vmem:[#allocation23_spill] sm:$0xff] %v2111_v3  ;;  %v727_v4 = vmax.f32 %v725_v60, %v2111_v3 }
 0x209   : > { %v2114_v5 = vpop.f32.mrb[24].mxu0 }
 0x20a   : > { %v691_v6 = vmax.f32 %v689_v62, %v2114_v5  ;;  %v2117_v7 = vpop.f32.mrb[25].mxu0 }
 0x20b   : > { %2557 = vst [vmem:[#allocation24_spill] sm:$0xff] %v2117_v7  ;;  %v728_v8 = vmax.f32 %v726_v0, %v2117_v7  ;;  %v2120_v9 = vpop.f32.mrb[26].mxu0 }
 0x20c   : > { %v692_v10 = vmax.f32 %v690_v2, %v2120_v9  ;;  %v2123_v11 = vpop.f32.mrb[27].mxu0 }
 0x20d   : > { %2558 = vst [vmem:[#allocation25_spill] sm:$0xff] %v2123_v11  ;;  %v729_v12 = vmax.f32 %v727_v4, %v2123_v11 }
 0x211   : > { %v2126_v13 = vpop.f32.mrb[28].mxu0 }
 0x212   : > { %v693_v14 = vmax.f32 %v691_v6, %v2126_v13  ;;  %v2129_v15 = vpop.f32.mrb[29].mxu0 }
 0x213   : > { %2559 = vst [vmem:[#allocation26_spill] sm:$0xff] %v2129_v15  ;;  %v730_v16 = vmax.f32 %v728_v8, %v2129_v15  ;;  %v2132_v17 = vpop.f32.mrb[30].mxu0 }
 0x214   : > { %v694_v18 = vmax.f32 %v692_v10, %v2132_v17  ;;  %v2135_v19 = vpop.f32.mrb[31].mxu0 }
 0x215   : > { %2560 = vst [vmem:[#allocation27_spill] sm:$0xff] %v2135_v19  ;;  %v731_v20 = vmax.f32 %v729_v12, %v2135_v19 }
 0x219   : > { %v2138_v21 = vpop.f32.mrb[32].mxu0 }
 0x21a   : > { %v695_v22 = vmax.f32 %v693_v14, %v2138_v21  ;;  %v2141_v23 = vpop.f32.mrb[33].mxu0 }
 0x21b   : > { %2561 = vst [vmem:[#allocation28_spill] sm:$0xff] %v2141_v23  ;;  %v732_v24 = vmax.f32 %v730_v16, %v2141_v23  ;;  %v2144_v30 = vpop.f32.mrb[34].mxu0 }
 0x21c   : > { %v696_v32 = vmax.f32 %v694_v18, %v2144_v30  ;;  %v2147_v34 = vpop.f32.mrb[35].mxu0 }
 0x21d   : > { %2562 = vst [vmem:[#allocation29_spill] sm:$0xff] %v2147_v34  ;;  %v733_v36 = vmax.f32 %v731_v20, %v2147_v34 }
 0x221   : > { %v2150_v38 = vpop.f32.mrb[36].mxu0 }
 0x222   : > { %v697_v40 = vmax.f32 %v695_v22, %v2150_v38  ;;  %v2153_v42 = vpop.f32.mrb[37].mxu0 }
 0x223   : > { %2563 = vst [vmem:[#allocation30_spill] sm:$0xff] %v2153_v42  ;;  %v734_v44 = vmax.f32 %v732_v24, %v2153_v42  ;;  %v2156_v46 = vpop.f32.mrb[38].mxu0 }
 0x224   : > { %v698_v48 = vmax.f32 %v696_v32, %v2156_v46  ;;  %v2159_v50 = vpop.f32.mrb[39].mxu0 }
 0x225   : > { %2564 = vst [vmem:[#allocation31_spill] sm:$0xff] %v2159_v50  ;;  %v735_v52 = vmax.f32 %v733_v36, %v2159_v50 }
 0x229   : > { %v2162_v54 = vpop.f32.mrb[40].mxu0 }
 0x22a   : > { %v699_v56 = vmax.f32 %v697_v40, %v2162_v54  ;;  %v2165_v58 = vpop.f32.mrb[41].mxu0 }
 0x22b   : > { %2565 = vst [vmem:[#allocation32_spill] sm:$0xff] %v2165_v58  ;;  %v736_v60 = vmax.f32 %v734_v44, %v2165_v58  ;;  %v2168_v62 = vpop.f32.mrb[42].mxu0 }
 0x22c   : > { %v700_v0 = vmax.f32 %v698_v48, %v2168_v62  ;;  %v2171_v2 = vpop.f32.mrb[43].mxu0 }
 0x22d   : > { %2566 = vst [vmem:[#allocation33_spill] sm:$0xff] %v2171_v2  ;;  %v737_v4 = vmax.f32 %v735_v52, %v2171_v2 }
 0x231   : > { %v2174_v6 = vpop.f32.mrb[44].mxu0 }
 0x232   : > { %v701_v8 = vmax.f32 %v699_v56, %v2174_v6  ;;  %v2177_v10 = vpop.f32.mrb[45].mxu0 }
 0x233   : > { %2567 = vst [vmem:[#allocation34_spill] sm:$0xff] %v2177_v10  ;;  %v738_v12 = vmax.f32 %v736_v60, %v2177_v10  ;;  %v2180_v14 = vpop.f32.mrb[46].mxu0  ;;  %v1413_v10 = vld [vmem:[%s1999_s26 + $0x4] ss:$8 sps:$4 sm:$0xff]  }
 0x234   : > { %v702_v16 = vmax.f32 %v700_v0, %v2180_v14  ;;  %v2183_v18 = vpop.f32.mrb[47].mxu0  ;;  %1011 = vmatprep.mubr.bf16.mxu1 %v1413_v10 }
 0x235   : > { %2568 = vst [vmem:[#allocation35_spill] sm:$0xff] %v2183_v18  ;;  %v739_v20 = vmax.f32 %v737_v4, %v2183_v18 }
 0x239   : > { %v2186_v22 = vpop.f32.mrb[48].mxu0 }
 0x23a   : > { %v703_v24 = vmax.f32 %v701_v8, %v2186_v22  ;;  %v2189_v32 = vpop.f32.mrb[49].mxu0 }
 0x23b   : > { %2569 = vst [vmem:[#allocation36_spill] sm:$0xff] %v2189_v32  ;;  %v740_v36 = vmax.f32 %v738_v12, %v2189_v32  ;;  %v2192_v40 = vpop.f32.mrb[50].mxu0 }
 0x23c   : > { %v704_v44 = vmax.f32 %v702_v16, %v2192_v40  ;;  %v2195_v48 = vpop.f32.mrb[51].mxu0 }
 0x23d   : > { %2570 = vst [vmem:[#allocation37_spill] sm:$0xff] %v2195_v48  ;;  %v741_v52 = vmax.f32 %v739_v20, %v2195_v48 }
 0x241   : > { %v2198_v56 = vpop.f32.mrb[52].mxu0 }
 0x242   : > { %v705_v60 = vmax.f32 %v703_v24, %v2198_v56  ;;  %v2201_v0 = vpop.f32.mrb[53].mxu0 }
 0x243   : > { %2571 = vst [vmem:[#allocation38_spill] sm:$0xff] %v2201_v0  ;;  %v742_v4 = vmax.f32 %v740_v36, %v2201_v0  ;;  %v2204_v8 = vpop.f32.mrb[54].mxu0 }
 0x244   : > { %v706_v12 = vmax.f32 %v704_v44, %v2204_v8  ;;  %v2207_v32 = vpop.f32.mrb[55].mxu0 }
 0x245   : > { %2572 = vst [vmem:[#allocation39_spill] sm:$0xff] %v2207_v32  ;;  %v743_v16 = vmax.f32 %v741_v52, %v2207_v32 }
 0x249   : > { %v2210_v18 = vpop.f32.mrb[56].mxu0 }
 0x24a   : > { %v707_v20 = vmax.f32 %v705_v60, %v2210_v18  ;;  %v2214_v48 = vpop.f32.mrb[57].mxu0 }
 0x24b   : > { %2573 = vst [vmem:[#allocation40_spill] sm:$0xff] %v2214_v48  ;;  %v744_v24 = vmax.f32 %v742_v4, %v2214_v48  ;;  %v2217_v2 = vpop.f32.mrb[58].mxu0 }
 0x24c   : > { %v708_v36 = vmax.f32 %v706_v12, %v2217_v2  ;;  %v2220_v0 = vpop.f32.mrb[59].mxu0 }
 0x24d   : > { %2574 = vst [vmem:[#allocation41_spill] sm:$0xff] %v2220_v0  ;;  %v745_v44 = vmax.f32 %v743_v16, %v2220_v0 }
 0x251   : > { %v672_v58 = vpop.f32.mrb[60].mxu0 }
 0x252   : > { %v709_v52 = vmax.f32 %v707_v20, %v672_v58  ;;  %v2223_v32 = vpop.f32.mrb[61].mxu0 }
 0x253   : > { %v746_v50 = vmax.f32 %v744_v24, %v2223_v32  ;;  %v676_v60 = vpop.f32.mrb[62].mxu0 }
 0x254   : > { %v710_v42 = vmax.f32 %v708_v36, %v676_v60  ;;  %v678_v34 = vpop.f32.mrb[63].mxu0 }
 0x255   : > { %v747_v23 = vmax.f32 %v745_v44, %v678_v34 }
 0x256   : > { %v711_v4 = vmax.f32 %v709_v52, %v710_v42 }
 0x257   : > { %v748_v48 = vmax.f32 %v746_v50, %v747_v23 }
 0x258   : > { %v712_v19 = vrot.slane %v711_v4, 4 }
 0x259   : > { %v749_v10 = vrot.slane %v748_v48, 4 }
 0x25a   : > { %v713_v15 = vmax.f32 %v711_v4, %v712_v19  ;;  %v2579_v4 = vld [vmem:[#allocation23_spill] sm:$0xff] }
 0x25b   : > { %v750_v12 = vmax.f32 %v748_v48, %v749_v10  ;;  %v2580_v10 = vld [vmem:[#allocation24_spill] sm:$0xff] }
 0x25c   : > { %v714_v11 = vrot.slane %v713_v15, 2 }
 0x25d   : > { %v751_v7 = vrot.slane %v750_v12, 2 }
 0x25e   : > { %v715_v3 = vmax.f32 %v713_v15, %v714_v11 }
 0x25f   : > { %v752_v16 = vmax.f32 %v750_v12, %v751_v7  ;;  %v2581_v12 = vld [vmem:[#allocation25_spill] sm:$0xff] }
 0x260   : > { %v716_v0 = vrot.slane %v715_v3, 1 }
 0x261   : > { %v753_v63 = vrot.slane %v752_v16, 1 }
 0x262   : > { %v2226_v20 = vmax.f32 %v715_v3, %v716_v0 }
 0x264   : > { %2575 = vst [vmem:[#allocation42_spill] sm:$0xff] %v2226_v20  ;;  %v815_v24 = vsub.f32 %v672_v58, %v2226_v20  ;;  %v817_v36 = vsub.f32 %v676_v60, %v2226_v20  ;;  %v765_v11 = vsub.f32 %v2072_v41, %v2226_v20  ;;  %v767_v50 = vsub.f32 %v2078_v45, %v2226_v20 }
 0x265   : > { %v769_v58 = vsub.f32 %v2084_v49, %v2226_v20  ;;  %v771_v48 = vsub.f32 %v2090_v53, %v2226_v20  ;;  %v773_v0 = vsub.f32 %v2096_v57, %v2226_v20  ;;  %v775_v44 = vsub.f32 %v2102_v61, %v2226_v20 }
 0x266   : > { %v2242_v15 = vpack.c.bf16 %v817_v36, %v815_v24  ;;  %v777_v41 = vsub.f32 %v2108_v1, %v2226_v20  ;;  %v779_v52 = vsub.f32 %v2114_v5, %v2226_v20  ;;  %v781_v45 = vsub.f32 %v2120_v9, %v2226_v20 }
 0x267   : > { %v783_v49 = vsub.f32 %v2126_v13, %v2226_v20  ;;  %v785_v53 = vsub.f32 %v2132_v17, %v2226_v20  ;;  %v2264_v60 = vmax.f32 %v752_v16, %v753_v63  ;;  %v787_v57 = vsub.f32 %v2138_v21, %v2226_v20 }
 0x268   : > { %2576 = vst [vmem:[#allocation43_spill] sm:$0xff] %v2242_v15  ;;  %v789_v61 = vsub.f32 %v2144_v30, %v2226_v20  ;;  %v791_v1 = vsub.f32 %v2150_v38, %v2226_v20  ;;  %v793_v5 = vsub.f32 %v2156_v46, %v2226_v20  ;;  %v795_v9 = vsub.f32 %v2162_v54, %v2226_v20 }
 0x269   : > { %v797_v13 = vsub.f32 %v2168_v62, %v2226_v20  ;;  %v799_v63 = vsub.f32 %v2174_v6, %v2226_v20  ;;  %v801_v17 = vsub.f32 %v2180_v14, %v2226_v20  ;;  %v803_v21 = vsub.f32 %v2186_v22, %v2226_v20 }
 0x26a   : > { %v805_v30 = vsub.f32 %v2192_v40, %v2226_v20  ;;  %v807_v38 = vsub.f32 %v2198_v56, %v2226_v20  ;;  %v809_v46 = vsub.f32 %v2204_v8, %v2226_v20  ;;  %v811_v54 = vsub.f32 %v2210_v18, %v2226_v20 }
 0x26b   : > { %v813_v62 = vsub.f32 %v2217_v2, %v2226_v20  ;;  %v816_v6 = vsub.f32 %v2223_v32, %v2264_v60  ;;  %v818_v14 = vsub.f32 %v678_v34, %v2264_v60  ;;  %v756_v22 = vsub.f32 %v2044_v26, %v2264_v60 }
 0x26c   : > { %v758_v40 = vsub.f32 %v2048_v28, %v2264_v60  ;;  %v760_v56 = vsub.f32 %v2054_v31, %v2264_v60  ;;  %v762_v18 = vsub.f32 %v2062_v35, %v2264_v60  ;;  %v764_v2 = vsub.f32 %v2069_v39, %v2264_v60  ;;  %v2578_v35 = vld [vmem:[#allocation22_spill] sm:$0xff] }
 0x26d   : > { %v766_v32 = vsub.f32 %v2075_v43, %v2264_v60  ;;  %v768_v34 = vsub.f32 %v2081_v47, %v2264_v60  ;;  %v2311_v8 = vpack.c.bf16 %v818_v14, %v816_v6  ;;  %v770_v26 = vsub.f32 %v2087_v51, %v2264_v60  ;;  %v2582_v51 = vld [vmem:[#allocation26_spill] sm:$0xff]  ;;  %v2585_v14 = vld [vmem:[#allocation29_spill] sm:$0xff] }
 0x26e   : > { %v772_v28 = vsub.f32 %v2093_v55, %v2264_v60  ;;  %v774_v31 = vsub.f32 %v2099_v59, %v2264_v60  ;;  %v776_v39 = vsub.f32 %v2578_v35, %v2264_v60  ;;  %v778_v43 = vsub.f32 %v2579_v4, %v2264_v60  ;;  %v2583_v55 = vld [vmem:[#allocation27_spill] sm:$0xff]  ;;  %v2584_v59 = vld [vmem:[#allocation28_spill] sm:$0xff]  ;;  %v2586_v4 = vld [vmem:[#allocation30_spill] sm:$0xff] }
 0x26f   : > { %2577 = vst [vmem:[#allocation44_spill] sm:$0xff] %v2311_v8  ;;  %v780_v47 = vsub.f32 %v2580_v10, %v2264_v60  ;;  %v782_v16 = vsub.f32 %v2581_v12, %v2264_v60  ;;  %v784_v24 = vsub.f32 %v2582_v51, %v2264_v60  ;;  %v786_v36 = vsub.f32 %v2583_v55, %v2264_v60  ;;  %v2587_v10 = vld [vmem:[#allocation31_spill] sm:$0xff]  ;;  %v2588_v12 = vld [vmem:[#allocation32_spill] sm:$0xff]  ;;  %v2589_v51 = vld [vmem:[#allocation33_spill] sm:$0xff] }
 0x270   : > { %v788_v6 = vsub.f32 %v2584_v59, %v2264_v60  ;;  %v790_v35 = vsub.f32 %v2585_v14, %v2264_v60  ;;  %v792_v3 = vsub.f32 %v2586_v4, %v2264_v60  ;;  %v794_v7 = vsub.f32 %v2587_v10, %v2264_v60  ;;  %v2590_v55 = vld [vmem:[#allocation34_spill] sm:$0xff]  ;;  %v2591_v59 = vld [vmem:[#allocation35_spill] sm:$0xff]  ;;  %v2592_v14 = vld [vmem:[#allocation36_spill] sm:$0xff] }
 0x271   : > { %v796_v19 = vsub.f32 %v2588_v12, %v2264_v60  ;;  %v798_v23 = vsub.f32 %v2589_v51, %v2264_v60  ;;  %v800_v42 = vsub.f32 %v2590_v55, %v2264_v60  ;;  %v802_v15 = vsub.f32 %v2591_v59, %v2264_v60  ;;  %v2593_v4 = vld [vmem:[#allocation37_spill] sm:$0xff]  ;;  %v2594_v10 = vld [vmem:[#allocation38_spill] sm:$0xff]  ;;  %v2595_v12 = vld [vmem:[#allocation39_spill] sm:$0xff] }
 0x272   : > { %v804_v8 = vsub.f32 %v2592_v14, %v2264_v60  ;;  %v806_v37 = vsub.f32 %v2593_v4, %v2264_v60  ;;  %v808_v33 = vsub.f32 %v2594_v10, %v2264_v60  ;;  %v810_v29 = vsub.f32 %v2595_v12, %v2264_v60  ;;  %v2596_v51 = vld [vmem:[#allocation40_spill] sm:$0xff]  ;;  %v2597_v55 = vld [vmem:[#allocation41_spill] sm:$0xff]  ;;  %v2598_v59 = vld [vmem:[#allocation42_spill] sm:$0xff] }
 0x273   : > { %v812_v27 = vsub.f32 %v2596_v51, %v2264_v60  ;;  %v814_v20 = vsub.f32 %v2597_v55, %v2264_v60  ;;  %v2599_v14 = vsub.f32 %v2042_v25, %v2598_v59  ;;  %v2600_v4 = vld [vmem:[#allocation18_spill] sm:$0xff]  ;;  %v2602_v51 = vld [vmem:[#allocation19_spill] sm:$0xff]  ;;  %v2604_v60 = vld [vmem:[#allocation20_spill] sm:$0xff] }
 0x274   : > { %v2601_v10 = vsub.f32 %v2600_v4, %v2598_v59  ;;  %v2603_v55 = vsub.f32 %v2602_v51, %v2598_v59  ;;  %v2605_v25 = vsub.f32 %v2604_v60, %v2598_v59  ;;  %v825_v60 = vpack.c.bf16 %v769_v58, %v767_v50 }
 0x275   : > { %v2382_v50 = vpack.c.bf16 %v797_v13, %v795_v9  ;;  %v2384_v58 = vpack.c.bf16 %v801_v17, %v799_v63  ;;  %v2394_v9 = vpack.c.bf16 %v798_v23, %v796_v19  ;;  %v2396_v13 = vpack.c.bf16 %v802_v15, %v800_v42 }
 0x276   : > { %v819_v12 = vpack.c.bf16 %v2601_v10, %v2599_v14  ;;  %v821_v4 = vpack.c.bf16 %v2605_v25, %v2603_v55  ;;  %v2606_v10 = vld [vmem:[#allocation21_spill] sm:$0xff]  ;;  %v827_v25 = vpack.c.bf16 %v773_v0, %v771_v48  ;;  %v829_v55 = vpack.c.bf16 %v777_v41, %v775_v44 }
 0x277   : > { %v2607_v14 = vsub.f32 %v2606_v10, %v2598_v59  ;;  %v2374_v10 = vpack.c.bf16 %v781_v45, %v779_v52  ;;  %v2376_v59 = vpack.c.bf16 %v785_v53, %v783_v49  ;;  %v2386_v0 = vpack.c.bf16 %v805_v30, %v803_v21 }
 0x278   : > { %v2388_v48 = vpack.c.bf16 %v809_v46, %v807_v38  ;;  %v2390_v41 = vpack.c.bf16 %v813_v62, %v811_v54  ;;  %v820_v44 = vpack.c.bf16 %v758_v40, %v756_v22  ;;  %v822_v45 = vpack.c.bf16 %v762_v18, %v760_v56 }
 0x279   : > { %v823_v51 = vpack.c.bf16 %v765_v11, %v2607_v14  ;;  %2608 = vst [vmem:[#allocation22_spill] sm:$0xff] %v2374_v10  ;;  %v2378_v11 = vpack.c.bf16 %v789_v61, %v787_v57  ;;  %v2380_v14 = vpack.c.bf16 %v793_v5, %v791_v1  ;;  %v824_v52 = vpack.c.bf16 %v766_v32, %v764_v2 }
 0x27a   : > { %v826_v10 = vpack.c.bf16 %v770_v26, %v768_v34  ;;  %v828_v49 = vpack.c.bf16 %v774_v31, %v772_v28  ;;  %v830_v53 = vpack.c.bf16 %v778_v43, %v776_v39  ;;  %v832_v57 = vpack.c.bf16 %v782_v16, %v780_v47 }
 0x27b   : > { %v834_v61 = vpack.c.bf16 %v786_v36, %v784_v24  ;;  %v836_v1 = vpack.c.bf16 %v790_v35, %v788_v6  ;;  %v2392_v5 = vpack.c.bf16 %v794_v7, %v792_v3  ;;  %v2398_v63 = vpack.c.bf16 %v806_v37, %v804_v8 }
 0x27c   : > { %v2400_v17 = vpack.c.bf16 %v810_v29, %v808_v33  ;;  %v2402_v21 = vpack.c.bf16 %v814_v20, %v812_v27  ;;  %v852_v30 = vmul.bf16 1069105081, %v819_v12  ;;  %v855_v38 = vmul.bf16 1069105081, %v820_v44 }
 0x27d   : > { %v861_v46 = vmul.bf16 1069105081, %v822_v45  ;;  %v858_v54 = vmul.bf16 1069105081, %v821_v4  ;;  %v867_v62 = vmul.bf16 1069105081, %v824_v52 }
 0x27e   : > { %1419 = vpow.bf16 %v855_v38  ;;  %v864_v7 = vmul.bf16 1069105081, %v823_v51  ;;  %v873_v23 = vmul.bf16 1069105081, %v826_v10  ;;  %v870_v42 = vmul.bf16 1069105081, %v825_v60 }
 0x27f   : > { %1421 = vpow.bf16 %v852_v30  ;;  %v879_v37 = vmul.bf16 1069105081, %v828_v49  ;;  %v876_v20 = vmul.bf16 1069105081, %v827_v25  ;;  %v885_v19 = vmul.bf16 1069105081, %v830_v53 }
 0x280   : > { %1423 = vpow.bf16 %v861_v46  ;;  %v882_v22 = vmul.bf16 1069105081, %v829_v55  ;;  %v891_v40 = vmul.bf16 1069105081, %v832_v57  ;;  %v2609_v2 = vld [vmem:[#allocation22_spill] sm:$0xff] }
 0x281   : > { %1425 = vpow.bf16 %v858_v54  ;;  %v888_v32 = vmul.bf16 1069105081, %v2609_v2  ;;  %v897_v34 = vmul.bf16 1069105081, %v834_v61  ;;  %v894_v28 = vmul.bf16 1069105081, %v2376_v59 }
 0x282   : > { %1427 = vpow.bf16 %v867_v62  ;;  %v903_v31 = vmul.bf16 1069105081, %v836_v1  ;;  %v900_v47 = vmul.bf16 1069105081, %v2378_v11  ;;  %v909_v16 = vmul.bf16 1069105081, %v2392_v5 }
 0x283   : > { %1429 = vpow.bf16 %v864_v7  ;;  %v906_v6 = vmul.bf16 1069105081, %v2380_v14  ;;  %v915_v35 = vmul.bf16 1069105081, %v2394_v9  ;;  %v912_v51 = vmul.bf16 1069105081, %v2382_v50 }
 0x284   : > { %1431 = vpow.bf16 %v873_v23  ;;  %v921_v60 = vmul.bf16 1069105081, %v2396_v13  ;;  %v918_v10 = vmul.bf16 1069105081, %v2384_v58  ;;  %v927_v59 = vmul.bf16 1069105081, %v2398_v63 }
 0x285   : > { %1433 = vpow.bf16 %v870_v42  ;;  %v924_v50 = vmul.bf16 1069105081, %v2386_v0  ;;  %v933_v44 = vmul.bf16 1069105081, %v2400_v17  ;;  %v930_v58 = vmul.bf16 1069105081, %v2388_v48 }
 0x286   : > { %1435 = vpow.bf16 %v879_v37  ;;  %v939_v49 = vmul.bf16 1069105081, %v2402_v21  ;;  %v936_v0 = vmul.bf16 1069105081, %v2390_v41  ;;  %v2610_v61 = vld [vmem:[#allocation44_spill] sm:$0xff]  ;;  %v2611_v13 = vld [vmem:[#allocation43_spill] sm:$0xff] }
 0x287   : > { %1437 = vpow.bf16 %v876_v20  ;;  %v945_v1 = vmul.bf16 1069105081, %v2610_v61  ;;  %v942_v63 = vmul.bf16 1069105081, %v2611_v13  ;;  %v1411_v54 = vld [vmem:[%s1999_s26] ss:$8 sps:$4 sm:$0xff]  }
 0x288   : > { %1439 = vpow.bf16 %v885_v19  ;;  %v1414_v62 = vld [vmem:[%s1999_s26 + $0x14] ss:$8 sps:$4 sm:$0xff]   ;;  %v951_v7 = vld [vmem:[%s1999_s26 + $0x20] sm:$0x11]  ;;  %v1416_v23 = vld [vmem:[%s1999_s26 + $0x10] ss:$8 sps:$4 sm:$0xff]  }
 0x289   : > { %v1420_v29 = vpop.eup %1419  ;;  %1441 = vpow.bf16 %v882_v22  ;;  %v1302_v42 = vcombine.high %v951_v7, %v951_v7  ;;  %v1301_v37 = vcombine.low %v951_v7, %v951_v7 }
 0x28a   : > { %v1422_v33 = vpop.eup %1421  ;;  %979 = vmatprep.subr.bf16.mxu1 %v1420_v29  ;;  %1443 = vpow.bf16 %v891_v40 }
 0x28b   : > { %v1424_v27 = vpop.eup %1423  ;;  %980 = vmatpush1.bf16.msra.mxu1 %v1422_v33  ;;  %1445 = vpow.bf16 %v888_v32 }
 0x28c   : > { %981 = vmatprep.subr.bf16.mxu1 %v1424_v27  ;;  %v1426_v3 = vpop.eup %1425  ;;  %1447 = vpow.bf16 %v897_v34 }
 0x28d   : > { %v1428_v15 = vpop.eup %1427  ;;  %1449 = vpow.bf16 %v894_v28 }
 0x28e   : > { %v1430_v56 = vpop.eup %1429  ;;  %1451 = vpow.bf16 %v903_v31 }
 0x28f   : > { %982 = vmatpush1.bf16.msra.mxu1 %v1426_v3  ;;  %v1432_v18 = vpop.eup %1431  ;;  %1453 = vpow.bf16 %v900_v47  ;;  %v1062_v47 = vld [vmem:[%s2004_s1 + $0x20] sm:$0xff] }
 0x290   : > { %983 = vmatprep.subr.bf16.mxu1 %v1428_v15  ;;  %v1434_v8 = vpop.eup %1433  ;;  %1455 = vpow.bf16 %v909_v16  ;;  %v1064_v16 = vld [vmem:[%s2004_s1 + $0x30] sm:$0xff] }
 0x291   : > { %v1436_v26 = vpop.eup %1435  ;;  %1457 = vpow.bf16 %v906_v6 }
 0x292   : > { %v1438_v39 = vpop.eup %1437  ;;  %1459 = vpow.bf16 %v915_v35 }
 0x293   : > { %984 = vmatpush1.bf16.msra.mxu1 %v1430_v56  ;;  %v1440_v43 = vpop.eup %1439  ;;  %1461 = vpow.bf16 %v912_v51  ;;  %v1042_v56 = vlaneseq  ;;  %v1061_v51 = vld [vmem:[%s2004_s1 + $0x18] sm:$0xff] }
 0x294   : > { %985 = vmatprep.subr.bf16.mxu1 %v1432_v18  ;;  %v1442_v24 = vpop.eup %1441  ;;  %1463 = vpow.bf16 %v921_v60  ;;  %v1063_v60 = vld [vmem:[%s2004_s1 + $0x28] sm:$0xff] }
 0x295   : > { %v1444_v36 = vpop.eup %1443  ;;  %1465 = vpow.bf16 %v918_v10  ;;  %v1043_v34 = vshrl.u32 %v1042_v56, 7 }
 0x296   : > { %v1446_v12 = vpop.eup %1445  ;;  %1467 = vpow.bf16 %v927_v59 }
 0x297   : > { %986 = vmatpush1.bf16.msra.mxu1 %v1434_v8  ;;  %v1448_v4 = vpop.eup %1447  ;;  %1469 = vpow.bf16 %v924_v50  ;;  %v1044_v8 = vsub.s32 0, %v1043_v34 }
 0x298   : > { %987 = vmatprep.subr.bf16.mxu1 %v1436_v26  ;;  %v1450_v25 = vpop.eup %1449  ;;  %1471 = vpow.bf16 %v933_v44 }
 0x299   : > { %v1452_v55 = vpop.eup %1451  ;;  %1473 = vpow.bf16 %v930_v58 }
 0x29a   : > { %v1454_v11 = vpop.eup %1453  ;;  %1475 = vpow.bf16 %v939_v49 }
 0x29b   : > { %988 = vmatpush1.bf16.msra.mxu1 %v1438_v39  ;;  %v1456_v14 = vpop.eup %1455  ;;  %1477 = vpow.bf16 %v936_v0  ;;  %v1058_v39 = vld [vmem:[%s2004_s1] sm:$0xff] }
 0x29c   : > { %989 = vmatprep.subr.bf16.mxu1 %v1440_v43  ;;  %v1458_v45 = vpop.eup %1457  ;;  %1479 = vpow.bf16 %v945_v1  ;;  %v1060_v43 = vld [vmem:[%s2004_s1 + $0x10] sm:$0xff] }
 0x29d   : > { %v1460_v52 = vpop.eup %1459  ;;  %1481 = vpow.bf16 %v942_v63 }
 0x29e   : > { %v1462_v53 = vpop.eup %1461 }
 0x29f   : > { %990 = vmatpush1.bf16.msra.mxu1 %v1442_v24  ;;  %v1464_v57 = vpop.eup %1463 }
 0x2a0   : > { %991 = vmatprep.subr.bf16.mxu1 %v1444_v36  ;;  %v1466_v5 = vpop.eup %1465  ;;  %v1059_v36 = vld [vmem:[%s2004_s1 + $0x8] sm:$0xff] }
 0x2a1   : > { %v1468_v9 = vpop.eup %1467 }
 0x2a2   : > { %v1470_v48 = vpop.eup %1469 }
 0x2a3   : > { %992 = vmatpush1.bf16.msra.mxu1 %v1446_v12  ;;  %v1472_v17 = vpop.eup %1471 }
 0x2a4   : > { %993 = vmatprep.subr.bf16.mxu1 %v1448_v4  ;;  %v1474_v41 = vpop.eup %1473 }
 0x2a5   : > { %v1476_v21 = vpop.eup %1475 }
 0x2a6   : > { %v1478_v30 = vpop.eup %1477 }
 0x2a7   : > { %994 = vmatpush1.bf16.msra.mxu1 %v1450_v25  ;;  %v1480_v38 = vpop.eup %1479  ;;  %v1065_v25 = vld [vmem:[%s2004_s1 + $0x38] sm:$0xff] }
 0x2a8   : > { %995 = vmatprep.subr.bf16.mxu1 %v1452_v55  ;;  %v1482_v46 = vpop.eup %1481 }
 0x2ab   : > { %996 = vmatpush1.bf16.msra.mxu1 %v1454_v11 }
 0x2ac   : > { %997 = vmatprep.subr.bf16.mxu1 %v1456_v14 }
 0x2af   : > { %998 = vmatpush1.bf16.msra.mxu1 %v1458_v45 }
 0x2b0   : > { %999 = vmatprep.subr.bf16.mxu1 %v1460_v52 }
 0x2b3   : > { %1000 = vmatpush1.bf16.msra.mxu1 %v1462_v53 }
 0x2b4   : > { %1001 = vmatprep.subr.bf16.mxu1 %v1464_v57 }
 0x2b7   : > { %1002 = vmatpush1.bf16.msra.mxu1 %v1466_v5 }
 0x2b8   : > { %1003 = vmatprep.subr.bf16.mxu1 %v1468_v9 }
 0x2bb   : > { %1004 = vmatpush1.bf16.msra.mxu1 %v1470_v48 }
 0x2bc   : > { %1005 = vmatprep.subr.bf16.mxu1 %v1472_v17 }
 0x2bf   : > { %1006 = vmatpush1.bf16.msra.mxu1 %v1474_v41 }
 0x2c0   : > { %1007 = vmatprep.subr.bf16.mxu1 %v1476_v21 }
 0x2c3   : > { %1008 = vmatpush1.bf16.msra.mxu1 %v1478_v30 }
 0x2c4   : > { %1009 = vmatprep.subr.bf16.mxu1 %v1480_v38 }
 0x2c7   : > { %1010 = vmatpush1.bf16.msra.mxu1 %v1482_v46 }
 0x2ca   : > { %1012 = vmatmul.mubr.bf16.vlgmr.msra.gmra.mrb[0].mxu1 %v1411_v54 }
 0x2cb   : > { %1021 = vmatprep.mubr.bf16.mxu1 %v1414_v62 }
 0x2d2   : > { %1022 = vmatmul.mubr.bf16.gmra.mrb[4].mxu1 %v1416_v23 }
 0x2d3   : > { %1031 = vmatprep.mubr.bf16.mxu1 %v1302_v42 }
 0x2da   : > { %1032 = vmatmul.mubr.bf16.gmra.mrb[8].mxu1 %v1301_v37 }
 0x39d   : > { %v1013_v29 = vpop.f32.mrb[0].mxu1 }
 0x39e   : > { %v1015_v33 = vpop.f32.mrb[1].mxu1 }
 0x39f   : > { %v1017_v27 = vpop.f32.mrb[2].mxu1 }
 0x3a0   : > { %v1019_v20 = vpop.f32.mrb[3].mxu1 }
 0x3a5   : > { %v1023_v19 = vpop.f32.mrb[4].mxu1 }
 0x3a6   : > { %v1025_v3 = vpop.f32.mrb[5].mxu1 }
 0x3a7   : > { %v1027_v15 = vpop.f32.mrb[6].mxu1 }
 0x3a8   : > { %v1029_v22 = vpop.f32.mrb[7].mxu1 }
 0x3ad   : > { %v1033_v40 = vpop.f32.mrb[8].mxu1 }
 0x3ae   : > { %1483 = vrcp.f32 %v1033_v40  ;;  %v1035_v18 = vpop.f32.mrb[9].mxu1 }
 0x3af   : > { %1485 = vrcp.f32 %v1035_v18  ;;  %v1037_v2 = vpop.f32.mrb[10].mxu1 }
 0x3b0   : > { %v1038_v32 = vpop.f32.mrb[11].mxu1 }
 0x3b8   : > { %v1484_v26 = vpop.eup %1483 }
 0x3b9   : > { %v1486_v28 = vpop.eup %1485  ;;  %v1045_v31 = vrot.slane %v1484_v26, %v1044_v8 }
 0x3ba   : > { %v1049_v24 = vrot.slane %v1486_v28, %v1044_v8 }
 0x3bb   : > { %v1050_v6 = vmul.f32 %v1045_v31, %v1013_v29  ;;  %v1052_v35 = vmul.f32 %v1045_v31, %v1017_v27  ;;  %v1054_v12 = vmul.f32 %v1045_v31, %v1023_v19  ;;  %v1056_v4 = vmul.f32 %v1045_v31, %v1027_v15 }
 0x3bc   : > { %v1051_v55 = vmul.f32 %v1049_v24, %v1015_v33  ;;  %v1053_v10 = vmul.f32 %v1049_v24, %v1019_v20  ;;  %v1055_v59 = vmul.f32 %v1049_v24, %v1025_v3  ;;  %v1057_v11 = vmul.f32 %v1049_v24, %v1029_v22 }
 0x3bd   : > { %v1066_v14 = vadd.f32 %v1058_v39, %v1050_v6  ;;  %v1068_v50 = vadd.f32 %v1060_v43, %v1052_v35  ;;  %v1070_v44 = vadd.f32 %v1062_v47, %v1054_v12  ;;  %v1072_v45 = vadd.f32 %v1064_v16, %v1056_v4 }
 0x3be   : > { %v1067_v52 = vadd.f32 %v1059_v36, %v1051_v55  ;;  %v1069_v58 = vadd.f32 %v1061_v51, %v1053_v10  ;;  %v1071_v49 = vadd.f32 %v1063_v60, %v1055_v59  ;;  %v1073_v53 = vadd.f32 %v1065_v25, %v1057_v11 }
 0x3bf   : > { %1074 = vst [vmem:[%s354_s27] sm:$0xff] %v1066_v14  ;;  %1076 = vst [vmem:[%s354_s27 + $0x10] sm:$0xff] %v1068_v50 }
 0x3c0   : > { %1078 = vst [vmem:[%s354_s27 + $0x20] sm:$0xff] %v1070_v44  ;;  %1080 = vst [vmem:[%s354_s27 + $0x30] sm:$0xff] %v1072_v45 }
 0x3c1   : > { %1075 = vst [vmem:[%s354_s27 + $0x8] sm:$0xff] %v1067_v52  ;;  %1077 = vst [vmem:[%s354_s27 + $0x18] sm:$0xff] %v1069_v58 }
 0x3c2   : > { %1079 = vst [vmem:[%s354_s27 + $0x28] sm:$0xff] %v1071_v49  ;;  %1081 = vst [vmem:[%s354_s27 + $0x38] sm:$0xff] %v1073_v53 }
 0x3c3   : > { %1620 = shalt.err (!%p1617_p7)
}
 0x3c4   : > { %s1621_s22 = scalar_lea.hbm %s2439_s23, 1024  ;;  %s1625_s8 = scalar_lea.hbm %s2494_s4, 2048 }
 0x3c5   : > { %p1622_p3 = scmp.ne.s32.totalorder %s2439_s23, %s1621_s22  ;;  %p1626_p12 = scmp.lt.u32.totalorder %s2439_s23, %s2494_s4 }
 0x3c6   : > { %p1627_p4 = scmp.lt.u32.totalorder %s1625_s8, %s1621_s22  ;;  %p1629_p0 = scmp.lt.u32.totalorder %s1621_s22, %s2439_s23 }
 0x3c7   : > { %p1623_p10 = pnand %p1622_p3, %p2612_p1 }
 0x3c8   : > { %p1628_p8 = por %p1627_p4, %p1626_p12 }
 0x3c9   : > { %p1624_p9 = pneg %p1623_p10 }
 0x3ca   : > { %p1630_p6 = por %p1629_p0, %p1628_p8 }
 0x3cc   : > { %p1631_p13 = pnand %p1630_p6, %p1624_p9 }
 0x3ce   : > { %1634 = shalt.err (!%p1631_p13)
}
 0x3cf   : > { %s1709_s12 = smov 256   ;;  %s1710_s26 = smov 16  }
 0x3d0   : > { %1323 = dma.vmem_to_hbm [thread:$0]  (%p2612_p1), %s2441_s9, 1024, %s2439_s23, %s1083_s0, %s1709_s12, %s1709_s12, %s1710_s26  }
 0x3d1 PF: > { %s1113_s11 = sand.u32 1, %s1677_s15   ;;  %p2613_p11 = scmp.ne.s32.totalorder %s2538_s30, 0 }
 0x3d2   : > { %p2614_p2 = scmp.ge.s32.totalorder %s1697_s20, 2  ;;  %s1114_s1 = scalar_lea.sflag [#allocation4], %s1113_s11 }
 0x3d4   : > { %p1339_p5 = pnand %p2614_p2, %p2613_p11 }
 0x3d6   : > { %1672 = dma.done.wait (!%p1339_p5), %s1114_s1, 1024  }
 0x3d7   : > { %1674 = vsyncadd (!%p1339_p5), %s1114_s1, 4294966272  ;;  %s26_s20 = sadd.s32 1, %s1697_s20   ;;  %s2615_s21 = sld [smem:[#allocation15_spill]] }
 0x3d8   : > { %p23_p7 = scmp.ge.s32.totalorder %s26_s20, 4   ;;  %s2616_s17 = sld [smem:[#allocation17_spill]] }
 0x3d9   : > { %s2617_s28 = sld [smem:[#allocation16_spill]]  ;;  %s2618_s15 = smov %s1681_s16 }
 0x3da   : > { %s2620_s18 = smov %s1693_s19  ;;  %25 = sbr.rel (!%p23_p7) target bundleno = 13 (0xd), region = 118 }
 0x3dd   : > { %s2619_s16 = smov %s2615_s21 }
 0x3df   : > { %s2621_s19 = smov %s2617_s28 }
 0x3e1   :  { %1119 = vsyncpa [#allocation3], 1 }
 0x3e2   :  { %1121 = vsyncpa [#allocation3 + $0x1], 1 }
 0x3e3   :  { %1122 = vsyncpa [#allocation6], 1 }
 0x3e4   :  { %1124 = vsyncpa [#allocation6 + $0x1], 1 }
 0x3e5   :  { %1125 = vsyncpa [#allocation9], 1 }
 0x3e6   :  { %1127 = vsyncpa [#allocation9 + $0x1], 1 }
 0x3e7   :  { %1128 = vsyncpa [#allocation4], 1 }
 0x3e8   :  { %1130 = vsyncpa [#allocation4 + $0x1], 1 }

</bundles_post_ra>
